<compile_context>
chip_gen: v5e
topology: v5e:2x2
jax: 0.10.0
libtpu: 0.0.40
codegen_flags: <defaults>
</compile_context>

<pallas_src>
import jax
import jax.numpy as jnp
from jax.experimental import pallas as pl
from jax.experimental.pallas import tpu as pltpu


_LANE = 128                              # lane width: last block dim multiple
_VMEM_LIMIT_BYTES = 32 * 1024 * 1024     # scoped VMEM we request (safe on v5e/v6e/v7x)
_VMEM_BUDGET_BYTES = 24 * 1024 * 1024    # budget for the double-buffered tiles
_SMALL_PROBLEM_BYTES = 1 << 19           # below this, fused XLA mean is faster


def _mean_fusion_kernel(*refs):
    """Sum E input tiles elementwise and scale by 1/E.

    refs = (z_ref_0, ..., z_ref_{E-1}, out_ref)
    """
    in_refs = refs[:-1]
    out_ref = refs[-1]
    inv_e = 1.0 / len(in_refs)

    acc = in_refs[0][...].astype(jnp.float32)
    for r in in_refs[1:]:
        acc = acc + r[...].astype(jnp.float32)
    out_ref[...] = (acc * inv_e).astype(out_ref.dtype)


def _round_up(x: int, m: int) -> int:
    return ((x + m - 1) // m) * m


def _choose_tiles(n: int, d: int, num_arrays: int, dtype_bytes: int):
    """Pick (n_pad, d_pad, tile_n, tile_d) for a memory-bound elementwise kernel."""
    # Sublane packing depends on element width: f32 -> 8, bf16 -> 16, int8 -> 32.
    sublane = max(8, 32 // dtype_bytes)

    # Lane-dense last dim; tile D (multiple of 128) so VMEM use is decoupled
    # from the hidden size.
    d_pad = _round_up(d, _LANE)
    tile_d = min(d_pad, 1024)
    while d_pad % tile_d != 0:
        tile_d -= _LANE

    # Largest tile_n (multiple of sublane) under the double-buffer VMEM budget:
    #   2 * num_arrays * tile_n * tile_d * dtype_bytes <= budget
    max_tile_n = _VMEM_BUDGET_BYTES // (2 * num_arrays * tile_d * dtype_bytes)
    max_tile_n = max(sublane, (max_tile_n // sublane) * sublane)
    tile_n = min(1024, max_tile_n, _round_up(n, sublane))
    tile_n = max(sublane, (tile_n // sublane) * sublane)

    n_pad = _round_up(n, tile_n)
    return n_pad, d_pad, tile_n, tile_d


def mean_fusion(ordered_zs, *, force_pallas: bool = False):
    """Fuse a list of (N, D) embeddings (already ordered) by elementwise mean."""
    num_edge_types = len(ordered_zs)
    assert num_edge_types >= 1
    n, d = ordered_zs[0].shape
    out_dtype = ordered_zs[0].dtype
    for z in ordered_zs:
        assert z.shape == (n, d), "all edge-type embeddings must share a shape"

    dtype_bytes = jnp.dtype(out_dtype).itemsize
    total_bytes = (num_edge_types + 1) * n * d * dtype_bytes
    if not force_pallas and total_bytes < _SMALL_PROBLEM_BYTES:
        # A single-block pallas_call pays fixed launch/prologue cost; XLA's
        # fused elementwise mean is strictly better at this size.
        stacked = jnp.stack([z.astype(jnp.float32) for z in ordered_zs], axis=0)
        return jnp.mean(stacked, axis=0).astype(out_dtype)

    n_pad, d_pad, tile_n, tile_d = _choose_tiles(
        n, d, num_edge_types + 1, dtype_bytes)

    needs_pad = (n_pad, d_pad) != (n, d)
    inputs = ordered_zs
    if needs_pad:
        inputs = [jnp.pad(z, ((0, n_pad - n), (0, d_pad - d))) for z in ordered_zs]

    grid = (n_pad // tile_n, d_pad // tile_d)
    block = pl.BlockSpec((tile_n, tile_d), lambda i, j: (i, j))

    out = pl.pallas_call(
        _mean_fusion_kernel,
        out_shape=jax.ShapeDtypeStruct((n_pad, d_pad), out_dtype),
        grid_spec=pltpu.PrefetchScalarGridSpec(
            num_scalar_prefetch=0,
            grid=grid,
            in_specs=[block] * num_edge_types,
            out_specs=block,
        ),
        compiler_params=pltpu.CompilerParams(
            dimension_semantics=("parallel", "parallel"),
            vmem_limit_bytes=_VMEM_LIMIT_BYTES,
        ),
    )(*inputs)

    if needs_pad:
        out = out[:n, :d]
    return out


class MeanFusion:
    """JAX/Pallas port of a concrete `Fusion(edge_types)` module."""

    def __init__(self, edge_types):
        self.edge_types = list(edge_types)

    def _to_ordered(self, zs):
        # Exact semantics of Fusion._to_ordered: order dict values by edge_types.
        return [zs[et] for et in self.edge_types]

    def __call__(self, zs, *, force_pallas: bool = False):
        return mean_fusion(self._to_ordered(zs), force_pallas=force_pallas)


def _reference(zs, edge_types):
    return jnp.mean(jnp.stack([zs[et] for et in edge_types], axis=0), axis=0)


if __name__ == "__main__":
    edge_types = ["drug-gene", "gene-gene", "gene-disease"]
    model = MeanFusion(edge_types)
    key = jax.random.PRNGKey(0)

    # Case 1: lane/sublane-aligned small shapes, Pallas path forced.
    N1, D1 = 64, 256
    keys = jax.random.split(key, len(edge_types))
    zs1 = {et: jax.random.normal(k, (N1, D1), dtype=jnp.float32)
           for et, k in zip(edge_types, keys)}
    out1 = jax.block_until_ready(model(zs1, force_pallas=True))
    assert out1.shape == (N1, D1)
    assert jnp.allclose(out1, _reference(zs1, edge_types), atol=1e-6, rtol=1e-6)

    # Case 2: unaligned shapes (N=50, D=96) exercising the pad-to-(8,128) path.
    N2, D2 = 50, 96
    keys2 = jax.random.split(jax.random.PRNGKey(1), len(edge_types))
    zs2 = {et: jax.random.normal(k, (N2, D2), dtype=jnp.float32)
           for et, k in zip(edge_types, keys2)}
    out2 = jax.block_until_ready(model(zs2, force_pallas=True))
    assert out2.shape == (N2, D2)
    assert jnp.allclose(out2, _reference(zs2, edge_types), atol=1e-6, rtol=1e-6)

    # Case 3: tiny problem -> automatic XLA fallback (no Pallas launch).
    N3, D3 = 16, 64
    keys3 = jax.random.split(jax.random.PRNGKey(2), len(edge_types))
    zs3 = {et: jax.random.normal(k, (N3, D3), dtype=jnp.float32)
           for et, k in zip(edge_types, keys3)}
    out3 = jax.block_until_ready(model(zs3))
    assert out3.shape == (N3, D3)
    assert jnp.allclose(out3, _reference(zs3, edge_types), atol=1e-6, rtol=1e-6)

    print("KERNEL_OK")
</pallas_src>

<mosaic_0001>
module attributes {stable_mosaic.version = 11 : i64} {
  func.func @_mean_fusion_kernel(%arg0: i32, %arg1: i32, %arg2: memref<64x256xf32, #tpu.memory_space<vmem>>, %arg3: memref<64x256xf32, #tpu.memory_space<vmem>>, %arg4: memref<64x256xf32, #tpu.memory_space<vmem>>, %arg5: memref<64x256xf32, #tpu.memory_space<vmem>>) attributes {dimension_semantics = [#tpu.dimension_semantics<parallel>, #tpu.dimension_semantics<parallel>], iteration_bounds = array<i64: 1, 1>, scalar_prefetch = 0 : i64, scratch_operands = 0 : i64, tpu.core_type = #tpu.core_type<tc>, window_params = [{transform_indices = @transform_0, window_bounds = array<i64: 64, 256>}, {transform_indices = @transform_1, window_bounds = array<i64: 64, 256>}, {transform_indices = @transform_2, window_bounds = array<i64: 64, 256>}, {transform_indices = @transform_3, window_bounds = array<i64: 64, 256>}]} {
    %c0 = arith.constant 0 : index
    %c0_0 = arith.constant 0 : index
    %0 = vector.load %arg2[%c0, %c0_0] : memref<64x256xf32, #tpu.memory_space<vmem>>, vector<64x256xf32>
    %c0_1 = arith.constant 0 : index
    %c0_2 = arith.constant 0 : index
    %1 = vector.load %arg3[%c0_1, %c0_2] : memref<64x256xf32, #tpu.memory_space<vmem>>, vector<64x256xf32>
    %2 = arith.addf %0, %1 : vector<64x256xf32>
    %c0_3 = arith.constant 0 : index
    %c0_4 = arith.constant 0 : index
    %3 = vector.load %arg4[%c0_3, %c0_4] : memref<64x256xf32, #tpu.memory_space<vmem>>, vector<64x256xf32>
    %4 = arith.addf %2, %3 : vector<64x256xf32>
    %cst = arith.constant 0.333333343 : f32
    %5 = vector.broadcast %cst : f32 to vector<64x256xf32>
    %6 = arith.mulf %4, %5 : vector<64x256xf32>
    %c0_5 = arith.constant 0 : index
    %c0_6 = arith.constant 0 : index
    %7 = vector.load %arg5[%c0_5, %c0_6] : memref<64x256xf32, #tpu.memory_space<vmem>>, vector<64x256xf32>
    tpu.vector_store %arg5[%c0_5, %c0_6], %6 {strides = array<i32>} : memref<64x256xf32, #tpu.memory_space<vmem>>, vector<64x256xf32>,
    return
  }
  func.func @transform_0(%arg0: i32, %arg1: i32) -> (i32, i32) {
    %c0_i32 = arith.constant 0 : i32
    return %arg0, %arg1 : i32, i32
  }
  func.func @transform_1(%arg0: i32, %arg1: i32) -> (i32, i32) {
    %c0_i32 = arith.constant 0 : i32
    return %arg0, %arg1 : i32, i32
  }
  func.func @transform_2(%arg0: i32, %arg1: i32) -> (i32, i32) {
    %c0_i32 = arith.constant 0 : i32
    return %arg0, %arg1 : i32, i32
  }
  func.func @transform_3(%arg0: i32, %arg1: i32) -> (i32, i32) {
    %c0_i32 = arith.constant 0 : i32
    return %arg0, %arg1 : i32, i32
  }
}

</mosaic_0001>

<bundles_post_ra>
// kernel: tpu_custom_call.1
= control target key start
LH: loop header
LB: loop body
LE: loop exit
PB: predicated region body
PF: predicated region fallthrough
CT: control target
= control target key end

     0   :  { %8 = vsyncpa [#allocation3], 0  ;;  %s352_s0 = inlined_call_operand.hbm [shape: f32[64,256], index: 0, kind: input, shape index: {}]   ;;  %s353_s1 = inlined_call_operand.hbm [shape: f32[64,256], index: 1, kind: input, shape index: {}]   ;;  %s354_s2 = inlined_call_operand.hbm [shape: f32[64,256], index: 2, kind: input, shape index: {}]   ;;  %s355_s3 = inlined_call_operand.hbm [shape: f32[64,256], index: 3, kind: output, shape index: {}]  }
   0x1   :  { %9 = vsyncpa [#allocation6], 0 }
   0x2   :  { %10 = vsyncpa [#allocation4], 0  ;;  %s28_s14 = sshll.u32 %s353_s1, 4  ;;  %s302_s15 = smov [#allocation5]   ;;  %s29_s14 = int_to_ptr.hbm [resolvable:$true] %s28_s14 }
   0x3   :  { %s30_s16 = sshll.u32 %s302_s15, 4  ;;  %s15_s19 = sshll.u32 %s352_s0, 4  ;;  %s31_s16 = int_to_ptr.vmem [resolvable:$true] %s30_s16  ;;  %s16_s19 = int_to_ptr.hbm [resolvable:$true] %s15_s19 }
   0x4   :  { %s303_s20 = smov 256   ;;  %s304_s21 = smov 16  }
   0x5   :  { %36 = dma.hbm_to_vmem [thread:$0]  %s29_s14, 2048, %s31_s16, [#allocation6], %s303_s20, %s303_s20, %s304_s21  }
   0x6   :  { %s305_s22 = smov [#allocation2]   ;;  %s41_s1 = sshll.u32 %s354_s2, 4  ;;  %s42_s1 = int_to_ptr.hbm [resolvable:$true] %s41_s1 }
   0x7   :  { %s17_s23 = sshll.u32 %s305_s22, 4  ;;  %s306_s0 = smov [#allocation7]   ;;  %s18_s23 = int_to_ptr.vmem [resolvable:$true] %s17_s23 }
   0x8   :  { %23 = dma.hbm_to_vmem [thread:$0]  %s16_s19, 2048, %s18_s23, [#allocation3], %s303_s20, %s303_s20, %s304_s21  }
   0x9   :  { %s43_s26 = sshll.u32 %s306_s0, 4  ;;  %s44_s26 = int_to_ptr.vmem [resolvable:$true] %s43_s26 }
   0xa   :  { %49 = dma.hbm_to_vmem [thread:$0]  %s42_s1, 2048, %s44_s26, [#allocation6], %s303_s20, %s303_s20, %s304_s21  }
   0xb   :  { %296 = dma.done.wait [#allocation3], 2048  }
   0xc   :  { %297 = vsyncadd [#allocation3], 4294965248 }
   0xd   :  { %298 = dma.done.wait [#allocation6], 4096  }
   0xe   :  { %299 = vsyncadd [#allocation6], 4294963200  ;;  %v62_v0 = vld [vmem:[#allocation2] sm:$0xff]  ;;  %v63_v4 = vld [vmem:[#allocation2 + $0x8] sm:$0xff]  ;;  %s307_s2 = smov [#allocation8]   ;;  %s180_s30 = sshll.u32 %s355_s3, 4  ;;  %s181_s30 = int_to_ptr.hbm [resolvable:$true] %s180_s30 }
   0xf   :  { %v78_v1 = vld [vmem:[#allocation5] sm:$0xff]  ;;  %v79_v5 = vld [vmem:[#allocation5 + $0x8] sm:$0xff]  ;;  %v64_v8 = vld [vmem:[#allocation2 + $0x10] sm:$0xff]  ;;  %s178_s27 = sshll.u32 %s307_s2, 4  ;;  %s179_s27 = int_to_ptr.vmem [resolvable:$true] %s178_s27 }
  0x10   :  { %v110_v2 = vld [vmem:[#allocation7] sm:$0xff]  ;;  %v94_v3 = vadd.f32 %v78_v1, %v62_v0  ;;  %v111_v6 = vld [vmem:[#allocation7 + $0x8] sm:$0xff]  ;;  %v95_v7 = vadd.f32 %v79_v5, %v63_v4  ;;  %v80_v9 = vld [vmem:[#allocation5 + $0x10] sm:$0xff] }
  0x11   :  { %v112_v10 = vld [vmem:[#allocation7 + $0x10] sm:$0xff]  ;;  %v96_v12 = vadd.f32 %v80_v9, %v64_v8  ;;  %v65_v13 = vld [vmem:[#allocation2 + $0x18] sm:$0xff]  ;;  %v66_v18 = vld [vmem:[#allocation2 + $0x20] sm:$0xff] }
  0x12   :  { %v126_v11 = vadd.f32 %v110_v2, %v94_v3  ;;  %v81_v14 = vld [vmem:[#allocation5 + $0x18] sm:$0xff]  ;;  %v127_v16 = vadd.f32 %v111_v6, %v95_v7  ;;  %v82_v19 = vld [vmem:[#allocation5 + $0x20] sm:$0xff]  ;;  %v67_v24 = vld [vmem:[#allocation2 + $0x28] sm:$0xff] }
  0x13   :  { %v113_v15 = vld [vmem:[#allocation7 + $0x18] sm:$0xff]  ;;  %v97_v17 = vadd.f32 %v81_v14, %v65_v13  ;;  %v114_v20 = vld [vmem:[#allocation7 + $0x20] sm:$0xff]  ;;  %v128_v22 = vadd.f32 %v112_v10, %v96_v12  ;;  %v98_v23 = vadd.f32 %v82_v19, %v66_v18  ;;  %v83_v25 = vld [vmem:[#allocation5 + $0x28] sm:$0xff] }
  0x14   :  { %v142_v21 = vmul.f32 0.33333334, %v126_v11  ;;  %v115_v26 = vld [vmem:[#allocation7 + $0x28] sm:$0xff]  ;;  %v143_v27 = vmul.f32 0.33333334, %v127_v16  ;;  %v99_v29 = vadd.f32 %v83_v25, %v67_v24  ;;  %v68_v30 = vld [vmem:[#allocation2 + $0x30] sm:$0xff] }
  0x15   :  { %v129_v28 = vadd.f32 %v113_v15, %v97_v17  ;;  %v84_v31 = vld [vmem:[#allocation5 + $0x30] sm:$0xff]  ;;  %v144_v33 = vmul.f32 0.33333334, %v128_v22  ;;  %v130_v34 = vadd.f32 %v114_v20, %v98_v23  ;;  %v69_v36 = vld [vmem:[#allocation2 + $0x38] sm:$0xff]  ;;  %v70_v42 = vld [vmem:[#allocation2 + $0x40] sm:$0xff] }
  0x16   :  { %v116_v32 = vld [vmem:[#allocation7 + $0x30] sm:$0xff]  ;;  %158 = vst [vmem:[#allocation8] sm:$0xff] %v142_v21  ;;  %v100_v35 = vadd.f32 %v84_v31, %v68_v30  ;;  %v85_v37 = vld [vmem:[#allocation5 + $0x38] sm:$0xff]  ;;  %v131_v40 = vadd.f32 %v115_v26, %v99_v29  ;;  %v86_v43 = vld [vmem:[#allocation5 + $0x40] sm:$0xff] }
  0x17   :  { %v117_v38 = vld [vmem:[#allocation7 + $0x38] sm:$0xff]  ;;  %159 = vst [vmem:[#allocation8 + $0x8] sm:$0xff] %v143_v27  ;;  %v145_v39 = vmul.f32 0.33333334, %v129_v28  ;;  %v101_v41 = vadd.f32 %v85_v37, %v69_v36  ;;  %v118_v44 = vld [vmem:[#allocation7 + $0x40] sm:$0xff]  ;;  %v102_v47 = vadd.f32 %v86_v43, %v70_v42  ;;  %v71_v48 = vld [vmem:[#allocation2 + $0x48] sm:$0xff] }
  0x18   :  { %160 = vst [vmem:[#allocation8 + $0x10] sm:$0xff] %v144_v33  ;;  %v146_v45 = vmul.f32 0.33333334, %v130_v34  ;;  %v132_v46 = vadd.f32 %v116_v32, %v100_v35  ;;  %v87_v49 = vld [vmem:[#allocation5 + $0x48] sm:$0xff]  ;;  %v147_v51 = vmul.f32 0.33333334, %v131_v40 }
  0x19   :  { %v119_v50 = vld [vmem:[#allocation7 + $0x48] sm:$0xff]  ;;  %161 = vst [vmem:[#allocation8 + $0x18] sm:$0xff] %v145_v39  ;;  %v133_v52 = vadd.f32 %v117_v38, %v101_v41  ;;  %v103_v53 = vadd.f32 %v87_v49, %v71_v48  ;;  %v72_v54 = vld [vmem:[#allocation2 + $0x50] sm:$0xff]  ;;  %v134_v58 = vadd.f32 %v118_v44, %v102_v47  ;;  %v73_v60 = vld [vmem:[#allocation2 + $0x58] sm:$0xff] }
  0x1a   :  { %v88_v55 = vld [vmem:[#allocation5 + $0x50] sm:$0xff]  ;;  %162 = vst [vmem:[#allocation8 + $0x20] sm:$0xff] %v146_v45  ;;  %v148_v57 = vmul.f32 0.33333334, %v132_v46  ;;  %v89_v61 = vld [vmem:[#allocation5 + $0x58] sm:$0xff]  ;;  %v74_v2 = vld [vmem:[#allocation2 + $0x60] sm:$0xff] }
  0x1b   :  { %v120_v56 = vld [vmem:[#allocation7 + $0x50] sm:$0xff]  ;;  %v104_v59 = vadd.f32 %v88_v55, %v72_v54  ;;  %v121_v62 = vld [vmem:[#allocation7 + $0x58] sm:$0xff]  ;;  %163 = vst [vmem:[#allocation8 + $0x28] sm:$0xff] %v147_v51  ;;  %v149_v63 = vmul.f32 0.33333334, %v133_v52  ;;  %v135_v0 = vadd.f32 %v119_v50, %v103_v53  ;;  %v105_v1 = vadd.f32 %v89_v61, %v73_v60  ;;  %v90_v3 = vld [vmem:[#allocation5 + $0x60] sm:$0xff] }
  0x1c   :  { %v122_v4 = vld [vmem:[#allocation7 + $0x60] sm:$0xff]  ;;  %164 = vst [vmem:[#allocation8 + $0x30] sm:$0xff] %v148_v57  ;;  %v150_v5 = vmul.f32 0.33333334, %v134_v58  ;;  %v106_v7 = vadd.f32 %v90_v3, %v74_v2  ;;  %v75_v8 = vld [vmem:[#allocation2 + $0x68] sm:$0xff]  ;;  %v76_v14 = vld [vmem:[#allocation2 + $0x70] sm:$0xff] }
  0x1d   :  { %v136_v6 = vadd.f32 %v120_v56, %v104_v59  ;;  %v91_v9 = vld [vmem:[#allocation5 + $0x68] sm:$0xff]  ;;  %165 = vst [vmem:[#allocation8 + $0x38] sm:$0xff] %v149_v63  ;;  %v151_v11 = vmul.f32 0.33333334, %v135_v0  ;;  %v137_v12 = vadd.f32 %v121_v62, %v105_v1  ;;  %v92_v15 = vld [vmem:[#allocation5 + $0x70] sm:$0xff]  ;;  %v77_v20 = vld [vmem:[#allocation2 + $0x78] sm:$0xff] }
  0x1e   :  { %v123_v10 = vld [vmem:[#allocation7 + $0x68] sm:$0xff]  ;;  %v107_v13 = vadd.f32 %v91_v9, %v75_v8  ;;  %v124_v16 = vld [vmem:[#allocation7 + $0x70] sm:$0xff]  ;;  %166 = vst [vmem:[#allocation8 + $0x40] sm:$0xff] %v150_v5  ;;  %v138_v18 = vadd.f32 %v122_v4, %v106_v7  ;;  %v108_v19 = vadd.f32 %v92_v15, %v76_v14  ;;  %v93_v21 = vld [vmem:[#allocation5 + $0x78] sm:$0xff] }
  0x1f   :  { %v152_v17 = vmul.f32 0.33333334, %v136_v6  ;;  %v125_v22 = vld [vmem:[#allocation7 + $0x78] sm:$0xff]  ;;  %167 = vst [vmem:[#allocation8 + $0x48] sm:$0xff] %v151_v11  ;;  %v153_v23 = vmul.f32 0.33333334, %v137_v12  ;;  %v109_v25 = vadd.f32 %v93_v21, %v77_v20 }
  0x20   :  { %v139_v24 = vadd.f32 %v123_v10, %v107_v13  ;;  %v154_v26 = vmul.f32 0.33333334, %v138_v18  ;;  %v140_v27 = vadd.f32 %v124_v16, %v108_v19 }
  0x21   :  { %168 = vst [vmem:[#allocation8 + $0x50] sm:$0xff] %v152_v17  ;;  %v141_v29 = vadd.f32 %v125_v22, %v109_v25 }
  0x22   :  { %169 = vst [vmem:[#allocation8 + $0x58] sm:$0xff] %v153_v23  ;;  %v155_v28 = vmul.f32 0.33333334, %v139_v24  ;;  %v156_v30 = vmul.f32 0.33333334, %v140_v27 }
  0x23   :  { %170 = vst [vmem:[#allocation8 + $0x60] sm:$0xff] %v154_v26  ;;  %v157_v31 = vmul.f32 0.33333334, %v141_v29 }
  0x24   :  { %171 = vst [vmem:[#allocation8 + $0x68] sm:$0xff] %v155_v28 }
  0x25   :  { %172 = vst [vmem:[#allocation8 + $0x70] sm:$0xff] %v156_v30 }
  0x26   :  { %173 = vst [vmem:[#allocation8 + $0x78] sm:$0xff] %v157_v31 }
  0x27   :  { %186 = dma.vmem_to_hbm [thread:$0]  %s179_s27, 2048, %s181_s30, [#allocation4], %s303_s20, %s303_s20, %s304_s21  }
  0x28   :  { %300 = dma.done.wait [#allocation4], 2048  }
  0x29   :  { %301 = vsyncadd [#allocation4], 4294965248 }
  0x2a   :  { %191 = vsyncpa [#allocation3], 1 }
  0x2b   :  { %192 = vsyncpa [#allocation6], 1 }
  0x2c   :  { %193 = vsyncpa [#allocation4], 1 }

</bundles_post_ra>
